<compile_context>
chip_gen: v5e
topology: v5e:2x2
jax: 0.10.0
libtpu: 0.0.40
codegen_flags: <defaults>
</compile_context>

<pallas_src>
import functools

import jax
import jax.numpy as jnp
from jax.experimental import pallas as pl
from jax.experimental.pallas import tpu as pltpu


def _swish_kernel(beta, x_ref, o_ref):
    x = x_ref[...]
    xf = x.astype(jnp.float32)
    # sigmoid -> exp + reciprocal land on the EUP; hidden under the HBM bound.
    y = xf * jax.nn.sigmoid(beta * xf)
    o_ref[...] = y.astype(o_ref.dtype)


def swish(x, beta=1.0, *, lane_width=512, target_block_bytes=4 * 1024 * 1024):
    """Elementwise Swish via a Pallas TPU kernel. Works for any input rank."""
    beta = float(beta)  # static constant baked into the kernel
    orig_shape = x.shape
    n = x.size
    if n == 0:
        return x

    # Flatten to 1-D, pad only the tail so the lane dim is a multiple of 128.
    flat = x.reshape(-1)
    padded_n = ((n + lane_width - 1) // lane_width) * lane_width
    if padded_n != n:
        flat = jnp.pad(flat, (0, padded_n - n))
    rows = padded_n // lane_width
    x2 = flat.reshape(rows, lane_width)

    # Row tile: ~target_block_bytes per block, multiple of the sublane packing
    # factor for this dtype (f32: 8, bf16: 16, int8/fp8: 32).
    itemsize = jnp.dtype(x.dtype).itemsize
    sublane_mult = max(8, 8 * (4 // max(1, itemsize)))
    target_rows = max(sublane_mult, target_block_bytes // (lane_width * itemsize))

    if rows <= target_rows:
        tile_r = rows  # full-extent block is always a legal block shape
    else:
        tile_r = max(sublane_mult, (target_rows // sublane_mult) * sublane_mult)

    grid = (pl.cdiv(rows, tile_r),)

    out = pl.pallas_call(
        functools.partial(_swish_kernel, beta),
        out_shape=jax.ShapeDtypeStruct((rows, lane_width), x.dtype),
        grid_spec=pltpu.PrefetchScalarGridSpec(
            num_scalar_prefetch=0,
            grid=grid,
            in_specs=[pl.BlockSpec((tile_r, lane_width), lambda i: (i, 0))],
            out_specs=pl.BlockSpec((tile_r, lane_width), lambda i: (i, 0)),
        ),
        compiler_params=pltpu.CompilerParams(
            dimension_semantics=("parallel",),
            vmem_limit_bytes=64 * 1024 * 1024,
        ),
    )(x2)

    y = out.reshape(-1)
    if padded_n != n:
        y = y[:n]
    return y.reshape(orig_shape)


if __name__ == "__main__":
    key = jax.random.PRNGKey(0)
    beta = 1.0

    # Shape consistent with the module's docstring example: (8, 40, 120).
    # 8*40*120 = 38400 = 75 * 512, so the lane-dense reshape needs no padding.
    x = jax.random.normal(key, (8, 40, 120), dtype=jnp.float32)
    y = jax.block_until_ready(swish(x, beta=beta))
    y_ref = x * jax.nn.sigmoid(beta * x)
    assert y.shape == x.shape and y.dtype == x.dtype
    assert jnp.allclose(y, y_ref, atol=1e-6, rtol=1e-6)

    # Ragged shape (total not a multiple of 128) exercises the tail-pad path.
    x2 = jax.random.normal(jax.random.PRNGKey(1), (3, 7, 50), dtype=jnp.float32)
    y2 = jax.block_until_ready(swish(x2, beta=beta))
    y2_ref = x2 * jax.nn.sigmoid(beta * x2)
    assert y2.shape == x2.shape and y2.dtype == x2.dtype
    assert jnp.allclose(y2, y2_ref, atol=1e-6, rtol=1e-6)

    # bf16 path (checks sublane-packing tile choice + in-register f32 upcast).
    x3 = jax.random.normal(jax.random.PRNGKey(2), (8, 40, 120), dtype=jnp.bfloat16)
    y3 = jax.block_until_ready(swish(x3, beta=beta))
    y3_ref = (x3.astype(jnp.float32)
              * jax.nn.sigmoid(beta * x3.astype(jnp.float32))).astype(jnp.bfloat16)
    assert y3.shape == x3.shape and y3.dtype == x3.dtype
    assert jnp.allclose(y3.astype(jnp.float32), y3_ref.astype(jnp.float32),
                        atol=1e-2, rtol=1e-2)

    print("KERNEL_OK")
</pallas_src>

<mosaic_0001>
module attributes {stable_mosaic.version = 11 : i64} {
  func.func @_swish_kernel(%arg0: i32, %arg1: memref<75x512xf32, #tpu.memory_space<vmem>>, %arg2: memref<75x512xf32, #tpu.memory_space<vmem>>) attributes {dimension_semantics = [#tpu.dimension_semantics<parallel>], iteration_bounds = array<i64: 1>, scalar_prefetch = 0 : i64, scratch_operands = 0 : i64, tpu.core_type = #tpu.core_type<tc>, window_params = [{transform_indices = @transform_0, window_bounds = array<i64: 75, 512>}, {transform_indices = @transform_1, window_bounds = array<i64: 75, 512>}]} {
    %c0 = arith.constant 0 : index
    %c0_0 = arith.constant 0 : index
    %0 = vector.load %arg1[%c0, %c0_0] : memref<75x512xf32, #tpu.memory_space<vmem>>, vector<75x512xf32>
    %cst = arith.constant 1.000000e+00 : f32
    %1 = vector.broadcast %cst : f32 to vector<75x512xf32>
    %2 = arith.mulf %1, %0 : vector<75x512xf32>
    %3 = arith.negf %2 : vector<75x512xf32>
    %4 = math.exp %3 : vector<75x512xf32>
    %cst_1 = arith.constant 1.000000e+00 : f32
    %5 = vector.broadcast %cst_1 : f32 to vector<75x512xf32>
    %6 = arith.addf %5, %4 : vector<75x512xf32>
    %7 = arith.divf %5, %6 : vector<75x512xf32>
    %8 = arith.mulf %0, %7 : vector<75x512xf32>
    %c0_2 = arith.constant 0 : index
    %c0_3 = arith.constant 0 : index
    %9 = vector.load %arg2[%c0_2, %c0_3] : memref<75x512xf32, #tpu.memory_space<vmem>>, vector<75x512xf32>
    tpu.vector_store %arg2[%c0_2, %c0_3], %8 {strides = array<i32>} : memref<75x512xf32, #tpu.memory_space<vmem>>, vector<75x512xf32>,
    return
  }
  func.func @transform_0(%arg0: i32) -> (i32, i32) {
    %c0_i32 = arith.constant 0 : i32
    %c0_i32_0 = arith.constant 0 : i32
    return %arg0, %c0_i32 : i32, i32
  }
  func.func @transform_1(%arg0: i32) -> (i32, i32) {
    %c0_i32 = arith.constant 0 : i32
    %c0_i32_0 = arith.constant 0 : i32
    return %arg0, %c0_i32 : i32, i32
  }
}

</mosaic_0001>

<bundles_post_ra>
// kernel: tpu_custom_call.1
= control target key start
LH: loop header
LB: loop body
LE: loop exit
PB: predicated region body
PF: predicated region fallthrough
CT: control target
= control target key end

     0   :  { %6 = vsyncpa [#allocation3], 0  ;;  %s2164_s0 = inlined_call_operand.hbm [shape: f32[75,512], index: 0, kind: input, shape index: {}]   ;;  %s2165_s1 = inlined_call_operand.hbm [shape: f32[75,512], index: 1, kind: output, shape index: {}]  }
   0x1   :  { %7 = vsyncpa [#allocation4], 0  ;;  %s12_s8 = sshll.u32 %s2164_s0, 4  ;;  %s1180_s9 = smov [#allocation2]   ;;  %s13_s8 = int_to_ptr.hbm [resolvable:$true] %s12_s8 }
   0x2   :  { %s14_s10 = sshll.u32 %s1180_s9, 4  ;;  %s1181_s11 = smov 512   ;;  %s15_s10 = int_to_ptr.vmem [resolvable:$true] %s14_s10 }
   0x3   :  { %s1182_s12 = smov 32  }
   0x4   :  { %20 = dma.hbm_to_vmem [thread:$0]  %s13_s8, 5120, %s15_s10, [#allocation3], %s1181_s11, %s1181_s11, %s1182_s12  }
   0x5   :  { %1176 = dma.done.wait [#allocation3], 5120  }
   0x6   :  { %1177 = vsyncadd [#allocation3], 4294962176  ;;  %v1200_v0 = vld [vmem:[#allocation2] sm:$0xff]  ;;  %v1202_v1 = vld [vmem:[#allocation2 + $0x8] sm:$0xff]  ;;  %s1183_s0 = smov [#allocation5]   ;;  %s911_s16 = sshll.u32 %s2165_s1, 4  ;;  %s912_s16 = int_to_ptr.hbm [resolvable:$true] %s911_s16 }
   0x7   :  { %v1204_v2 = vld [vmem:[#allocation2 + $0x10] sm:$0xff]  ;;  %v924_v3 = vmul.f32 -1.442695, %v1200_v0  ;;  %v925_v4 = vmul.f32 -1.442695, %v1202_v1  ;;  %v1209_v6 = vld [vmem:[#allocation2 + $0x18] sm:$0xff] }
   0x8   :  { %v926_v5 = vmul.f32 -1.442695, %v1204_v2  ;;  %v1211_v7 = vld [vmem:[#allocation2 + $0x20] sm:$0xff]  ;;  %v1213_v8 = vld [vmem:[#allocation2 + $0x28] sm:$0xff]  ;;  %v927_v9 = vmul.f32 -1.442695, %v1209_v6 }
   0x9   :  { %968 = vpow2.f32 %v924_v3  ;;  %v928_v10 = vmul.f32 -1.442695, %v1211_v7  ;;  %v929_v11 = vmul.f32 -1.442695, %v1213_v8  ;;  %v1218_v12 = vld [vmem:[#allocation2 + $0x30] sm:$0xff]  ;;  %v1220_v13 = vld [vmem:[#allocation2 + $0x38] sm:$0xff] }
   0xa   :  { %970 = vpow2.f32 %v925_v4  ;;  %v930_v14 = vmul.f32 -1.442695, %v1218_v12  ;;  %v931_v15 = vmul.f32 -1.442695, %v1220_v13  ;;  %v1224_v16 = vld [vmem:[#allocation2 + $0x40] sm:$0xff]  ;;  %s909_s13 = sshll.u32 %s1183_s0, 4  ;;  %s910_s13 = int_to_ptr.vmem [resolvable:$true] %s909_s13 }
   0xb   :  { %972 = vpow2.f32 %v926_v5  ;;  %v932_v22 = vmul.f32 -1.442695, %v1224_v16  ;;  %v1392_v63 = vld [vmem:[#allocation2 + $0x60] sm:$0xff] }
   0xc   :  { %974 = vpow2.f32 %v927_v9 }
   0xd   :  { %976 = vpow2.f32 %v928_v10 }
   0xe   :  { %978 = vpow2.f32 %v929_v11 }
   0xf   :  { %v969_v17 = vpop.eup %968  ;;  %980 = vpow2.f32 %v930_v14  ;;  %v1402_v14 = vld [vmem:[#allocation2 + $0x78] sm:$0xff] }
  0x10   :  { %v971_v18 = vpop.eup %970  ;;  %v1226_v19 = vadd.f32 1.0, %v969_v17  ;;  %982 = vpow2.f32 %v931_v15 }
  0x11   :  { %v973_v20 = vpop.eup %972  ;;  %v1228_v21 = vadd.f32 1.0, %v971_v18 }
  0x12   :  { %v975_v23 = vpop.eup %974  ;;  %984 = vrcp.f32 %v1226_v19  ;;  %v236_v24 = vand.u32 2147483648, %v1226_v19  ;;  %v234_v26 = vand.u32 2147483647, %v1226_v19  ;;  %v1237_v30 = vadd.f32 1.0, %v973_v20 }
  0x13   :  { %v977_v25 = vpop.eup %976  ;;  %986 = vrcp.f32 %v1228_v21  ;;  %v249_v28 = vand.u32 2147483647, %v1228_v21  ;;  %v251_v29 = vand.u32 2147483648, %v1228_v21  ;;  %v1239_v31 = vadd.f32 1.0, %v975_v23 }
  0x14   :  { %v979_v27 = vpop.eup %978  ;;  %vm230_vm0 = vweird.f32 %v1226_v19  ;;  %v1242_v32 = vadd.f32 1.0, %v977_v25  ;;  %988 = vpow2.f32 %v932_v22  ;;  %v1244_v34 = vor.u32 1.1754944e-38, %v236_v24 }
  0x15   :  { %v981_v33 = vpop.eup %980  ;;  %vm245_vm1 = vweird.f32 %v1228_v21  ;;  %990 = vrcp.f32 %v1237_v30  ;;  %v266_v35 = vand.u32 2147483648, %v1237_v30  ;;  %vm1249_vm2 = vcmp.eq.f32.partialorder %v234_v26, 8.507059e+37 }
  0x16   :  { %v983_v36 = vpop.eup %982  ;;  %v264_v38 = vand.u32 2147483647, %v1237_v30  ;;  %992 = vrcp.f32 %v1239_v31  ;;  %v281_v39 = vand.u32 2147483648, %v1239_v31  ;;  %v1256_v40 = vadd.f32 1.0, %v979_v27 }
  0x17   :  { %vm1258_vm3 = vcmp.eq.f32.partialorder %v249_v28, 8.507059e+37  ;;  %v252_v43 = vor.u32 1.1754944e-38, %v251_v29  ;;  %vm260_vm4 = vweird.f32 %v1237_v30  ;;  %v279_v44 = vand.u32 2147483647, %v1239_v31 }
  0x18   :  { %v985_v41 = vpop.eup %984  ;;  %994 = vrcp.f32 %v1242_v32  ;;  %v1266_v47 = vor.u32 1.1754944e-38, %v266_v35  ;;  %vm275_vm5 = vweird.f32 %v1239_v31  ;;  %vm290_vm6 = vweird.f32 %v1242_v32 }
  0x19   :  { %v987_v45 = vpop.eup %986  ;;  %v226_v46 = vmul.f32 %v985_v41, %v1226_v19  ;;  %vm231_vm7 = vweird.f32 %v985_v41  ;;  %v294_v49 = vand.u32 2147483647, %v1242_v32  ;;  %v296_v50 = vand.u32 2147483648, %v1242_v32 }
  0x1a   :  { %v241_v48 = vmul.f32 %v987_v45, %v1228_v21  ;;  %v989_v51 = vpop.eup %988  ;;  %vm246_vm8 = vweird.f32 %v987_v45  ;;  %vm1273_vm9 = vcmp.eq.f32.partialorder %v264_v38, 8.507059e+37  ;;  %v282_v54 = vor.u32 1.1754944e-38, %v281_v39  ;;  %vm1293_vm13 = vmor %vm230_vm0, %vm231_vm7 }
  0x1b   :  { %v227_v52 = vsub.f32 1.0, %v226_v46  ;;  %996 = vrcp.f32 %v1256_v40  ;;  %v991_v55 = vpop.eup %990  ;;  %vm1278_vm10 = vcmp.eq.f32.partialorder %v279_v44, 8.507059e+37  ;;  %v309_v58 = vand.u32 2147483647, %v1256_v40  ;;  %vm1301_vm11 = vmor %vm245_vm1, %vm246_vm8 }
  0x1c   :  { %v242_v56 = vsub.f32 1.0, %v241_v48  ;;  %v311_v59 = vand.u32 2147483648, %v1256_v40  ;;  %v993_v60 = vpop.eup %992  ;;  %v256_v62 = vmul.f32 %v991_v55, %v1237_v30  ;;  %vm1286_vm12 = vcmp.eq.f32.partialorder %v294_v49, 8.507059e+37  ;;  %v1354_v48 = vld [vmem:[#allocation2 + $0x48] sm:$0xff]  ;;  %v1356_v49 = vld [vmem:[#allocation2 + $0x50] sm:$0xff] }
  0x1d   :  { %v228_v61 = vmul.f32 %v985_v41, %v227_v52  ;;  %v297_v3 = vor.u32 1.1754944e-38, %v296_v50  ;;  %vm261_vm14 = vweird.f32 %v991_v55  ;;  %v271_v10 = vmul.f32 %v993_v60, %v1239_v31 }
  0x1e   :  { %v995_v4 = vpop.eup %994  ;;  %v243_v9 = vmul.f32 %v987_v45, %v242_v56  ;;  %vm276_vm15 = vweird.f32 %v993_v60  ;;  %v257_v15 = vsub.f32 1.0, %v256_v62  ;;  %v312_v18 = vor.u32 1.1754944e-38, %v311_v59  ;;  %vm1320_vm1 = vmor %vm260_vm4, %vm261_vm14 }
  0x1f   :  { %v229_v11 = vadd.f32 %v985_v41, %v228_v61  ;;  %v286_v17 = vmul.f32 %v995_v4, %v1242_v32  ;;  %v272_v20 = vsub.f32 1.0, %v271_v10  ;;  %vm291_vm0 = vweird.f32 %v995_v4 }
  0x20   :  { %v244_v19 = vadd.f32 %v987_v45, %v243_v9  ;;  %v1306_v22 = vadd.f32 1.0, %v981_v33  ;;  %v258_v25 = vmul.f32 %v991_v55, %v257_v15  ;;  %v1310_v21 = vadd.f32 1.0, %v983_v36  ;;  %vm1339_vm4 = vmor %vm290_vm6, %vm291_vm0 }
  0x21   :  { %v997_v23 = vpop.eup %996  ;;  %v233_v24 = vsel %vm1293_vm13, %v985_v41, %v229_v11  ;;  %v287_v26 = vsub.f32 1.0, %v286_v17  ;;  %v273_v33 = vmul.f32 %v993_v60, %v272_v20  ;;  %v1346_v44 = vadd.f32 1.0, %v989_v51  ;;  %v1400_v11 = vld [vmem:[#allocation2 + $0x70] sm:$0xff]  ;;  %v1406_v17 = vld [vmem:[#allocation2 + $0x80] sm:$0xff] }
  0x22   :  { %v238_v27 = vsel %vm1249_vm2, %v1244_v34, %v233_v24  ;;  %v248_v28 = vsel %vm1301_vm11, %v987_v45, %v244_v19  ;;  %v301_v35 = vmul.f32 %v997_v23, %v1256_v40  ;;  %v259_v37 = vadd.f32 %v991_v55, %v258_v25  ;;  %vm1331_vm2 = vmor %vm275_vm5, %vm276_vm15 }
  0x23   :  { %v825_v36 = vmul.f32 %v238_v27, %v1200_v0  ;;  %v253_v38 = vsel %vm1258_vm3, %v252_v43, %v248_v28  ;;  %v288_v30 = vmul.f32 %v995_v4, %v287_v26  ;;  %v274_v41 = vadd.f32 %v993_v60, %v273_v33 }
  0x24   :  { %v826_v39 = vmul.f32 %v253_v38, %v1202_v1  ;;  %v302_v42 = vsub.f32 1.0, %v301_v35  ;;  %vm306_vm3 = vweird.f32 %v997_v23  ;;  %v263_v31 = vsel %vm1320_vm1, %v991_v55, %v259_v37  ;;  %v1371_v55 = vld [vmem:[#allocation2 + $0x58] sm:$0xff] }
  0x25   :  { %865 = vst [vmem:[#allocation5] sm:$0xff] %v825_v36  ;;  %v289_v43 = vadd.f32 %v995_v4, %v288_v30  ;;  %998 = vrcp.f32 %v1306_v22  ;;  %v268_v1 = vsel %vm1273_vm9, %v1266_v47, %v263_v31  ;;  %v278_v32 = vsel %vm1331_vm2, %v993_v60, %v274_v41 }
  0x26   :  { %866 = vst [vmem:[#allocation5 + $0x8] sm:$0xff] %v826_v39  ;;  %v303_v45 = vmul.f32 %v997_v23, %v302_v42  ;;  %v324_v46 = vand.u32 2147483647, %v1306_v22  ;;  %v827_v50 = vmul.f32 %v268_v1, %v1204_v2  ;;  %v283_v51 = vsel %vm1278_vm10, %v282_v54, %v278_v32 }
  0x27   :  { %v293_v52 = vsel %vm1339_vm4, %v995_v4, %v289_v43  ;;  %vm2186_vm5 = vweird.f32 %v1256_v40  ;;  %v326_v53 = vand.u32 2147483648, %v1306_v22  ;;  %v828_v56 = vmul.f32 %v283_v51, %v1209_v6 }
  0x28   :  { %vm1366_vm6 = vmor %vm2186_vm5, %vm306_vm3  ;;  %v298_v2 = vsel %vm1286_vm12, %v297_v3, %v293_v52  ;;  %v304_v54 = vadd.f32 %v997_v23, %v303_v45  ;;  %vm310_vm7 = vcmp.eq.f32.partialorder %v309_v58, 8.507059e+37  ;;  %867 = vst [vmem:[#allocation5 + $0x10] sm:$0xff] %v827_v50  ;;  %1000 = vrcp.f32 %v1310_v21  ;;  %v1394_v3 = vld [vmem:[#allocation2 + $0x68] sm:$0xff] }
  0x29   :  { %v829_v57 = vmul.f32 %v298_v2, %v1211_v7  ;;  %v933_v59 = vmul.f32 -1.442695, %v1354_v48  ;;  %v934_v60 = vmul.f32 -1.442695, %v1356_v49  ;;  %868 = vst [vmem:[#allocation5 + $0x18] sm:$0xff] %v828_v56  ;;  %vm320_vm8 = vweird.f32 %v1306_v22  ;;  %v1453_v56 = vld [vmem:[#allocation2 + $0x90] sm:$0xff] }
  0x2a   :  { %v308_v6 = vsel %vm1366_vm6, %v997_v23, %v304_v54  ;;  %1002 = vrcp.f32 %v1346_v44  ;;  %v935_v40 = vmul.f32 -1.442695, %v1371_v55  ;;  %vm1387_vm9 = vcmp.eq.f32.partialorder %v324_v46, 8.507059e+37  ;;  %v1455_v2 = vld [vmem:[#allocation2 + $0x98] sm:$0xff] }
  0x2b   :  { %v999_v58 = vpop.eup %998  ;;  %869 = vst [vmem:[#allocation5 + $0x20] sm:$0xff] %v829_v57  ;;  %v313_v61 = vsel %vm310_vm7, %v312_v18, %v308_v6  ;;  %v327_v62 = vor.u32 1.1754944e-38, %v326_v53  ;;  %vm335_vm10 = vweird.f32 %v1310_v21  ;;  %v339_v9 = vand.u32 2147483647, %v1310_v21  ;;  %v1408_v18 = vld [vmem:[#allocation2 + $0x88] sm:$0xff] }
  0x2c   :  { %v830_v4 = vmul.f32 %v313_v61, %v1213_v8  ;;  %v316_v5 = vmul.f32 %v999_v58, %v1306_v22  ;;  %v341_v10 = vand.u32 2147483648, %v1310_v21  ;;  %vm321_vm11 = vweird.f32 %v999_v58 }
  0x2d   :  { %vm350_vm12 = vweird.f32 %v1346_v44  ;;  %v354_v15 = vand.u32 2147483647, %v1346_v44  ;;  %1004 = vpow2.f32 %v933_v59  ;;  %v936_v19 = vmul.f32 -1.442695, %v1392_v63  ;;  %vm1420_vm13 = vmor %vm320_vm8, %vm321_vm11 }
  0x2e   :  { %870 = vst [vmem:[#allocation5 + $0x28] sm:$0xff] %v830_v4  ;;  %v317_v8 = vsub.f32 1.0, %v316_v5  ;;  %1006 = vpow2.f32 %v934_v60  ;;  %v937_v20 = vmul.f32 -1.442695, %v1394_v3  ;;  %v1001_v23 = vpop.eup %1000  ;;  %v356_v24 = vand.u32 2147483648, %v1346_v44 }
  0x2f   :  { %1008 = vpow2.f32 %v935_v40  ;;  %v938_v25 = vmul.f32 -1.442695, %v1400_v11  ;;  %v939_v26 = vmul.f32 -1.442695, %v1402_v14  ;;  %v331_v29 = vmul.f32 %v1001_v23, %v1310_v21 }
  0x30   :  { %v1003_v27 = vpop.eup %1002  ;;  %v318_v28 = vmul.f32 %v999_v58, %v317_v8  ;;  %1010 = vpow2.f32 %v936_v19  ;;  %v940_v33 = vmul.f32 -1.442695, %v1406_v17  ;;  %vm1424_vm14 = vcmp.eq.f32.partialorder %v339_v9, 8.507059e+37 }
  0x31   :  { %v346_v38 = vmul.f32 %v1003_v27, %v1346_v44  ;;  %1012 = vpow2.f32 %v937_v20  ;;  %v941_v37 = vmul.f32 -1.442695, %v1408_v18  ;;  %v332_v30 = vsub.f32 1.0, %v331_v29  ;;  %v1463_v44 = vld [vmem:[#allocation2 + $0xa0] sm:$0xff] }
  0x32   :  { %v319_v34 = vadd.f32 %v999_v58, %v318_v28  ;;  %vm336_vm15 = vweird.f32 %v1001_v23  ;;  %1014 = vpow2.f32 %v938_v25  ;;  %v342_v41 = vor.u32 1.1754944e-38, %v341_v10 }
  0x33   :  { %v1005_v39 = vpop.eup %1004  ;;  %v347_v22 = vsub.f32 1.0, %v346_v38  ;;  %vm351_vm0 = vweird.f32 %v1003_v27  ;;  %1016 = vpow2.f32 %v939_v26  ;;  %v333_v31 = vmul.f32 %v1001_v23, %v332_v30  ;;  %vm1438_vm1 = vmor %vm335_vm10, %vm336_vm15 }
  0x34   :  { %v1007_v0 = vpop.eup %1006  ;;  %v323_v42 = vsel %vm1420_vm13, %v999_v58, %v319_v34  ;;  %v1432_v43 = vadd.f32 1.0, %v1005_v39  ;;  %1018 = vpow2.f32 %v940_v33  ;;  %vm1448_vm2 = vmor %vm350_vm12, %vm351_vm0  ;;  %v357_v21 = vor.u32 1.1754944e-38, %v356_v24 }
  0x35   :  { %v1009_v1 = vpop.eup %1008  ;;  %v328_v32 = vsel %vm1387_vm9, %v327_v62, %v323_v42  ;;  %v348_v46 = vmul.f32 %v1003_v27, %v347_v22  ;;  %v1442_v50 = vadd.f32 1.0, %v1007_v0  ;;  %1020 = vpow2.f32 %v941_v37 }
  0x36   :  { %v1011_v51 = vpop.eup %1010  ;;  %v831_v52 = vmul.f32 %v328_v32, %v1218_v12  ;;  %v334_v47 = vadd.f32 %v1001_v23, %v333_v31  ;;  %1022 = vrcp.f32 %v1432_v43  ;;  %vm1457_vm4 = vcmp.eq.f32.partialorder %v354_v15, 8.507059e+37 }
  0x37   :  { %v1013_v54 = vpop.eup %1012  ;;  %v349_v57 = vadd.f32 %v1003_v27, %v348_v46  ;;  %v369_v12 = vand.u32 2147483647, %v1432_v43  ;;  %1024 = vrcp.f32 %v1442_v50  ;;  %v371_v40 = vand.u32 2147483648, %v1432_v43 }
  0x38   :  { %v1015_v60 = vpop.eup %1014  ;;  %871 = vst [vmem:[#allocation5 + $0x30] sm:$0xff] %v831_v52  ;;  %v338_v6 = vsel %vm1438_vm1, %v1001_v23, %v334_v47  ;;  %v384_v58 = vand.u32 2147483647, %v1442_v50  ;;  %v386_v61 = vand.u32 2147483648, %v1442_v50  ;;  %v1475_v5 = vmul.f32 -1.442695, %v1453_v56 }
  0x39   :  { %v1017_v7 = vpop.eup %1016  ;;  %v343_v62 = vsel %vm1424_vm14, %v342_v41, %v338_v6  ;;  %v353_v4 = vsel %vm1448_vm2, %v1003_v27, %v349_v57  ;;  %v1478_v9 = vmul.f32 -1.442695, %v1455_v2  ;;  %vm365_vm3 = vweird.f32 %v1432_v43 }
  0x3a   :  { %v1019_v10 = vpop.eup %1018  ;;  %v832_v15 = vmul.f32 %v343_v62, %v1220_v13  ;;  %v358_v8 = vsel %vm1457_vm4, %v357_v21, %v353_v4  ;;  %v1485_v19 = vmul.f32 -1.442695, %v1463_v44  ;;  %vm380_vm5 = vweird.f32 %v1442_v50 }
  0x3b   :  { %v1021_v20 = vpop.eup %1020  ;;  %v833_v23 = vmul.f32 %v358_v8, %v1224_v16  ;;  %v1489_v24 = vadd.f32 1.0, %v1009_v1  ;;  %v1491_v25 = vadd.f32 1.0, %v1011_v51  ;;  %vm1493_vm6 = vcmp.eq.f32.partialorder %v369_v12, 8.507059e+37 }
  0x3c   :  { %v1023_v26 = vpop.eup %1022  ;;  %872 = vst [vmem:[#allocation5 + $0x38] sm:$0xff] %v832_v15  ;;  %v372_v27 = vor.u32 1.1754944e-38, %v371_v40  ;;  %vm1497_vm7 = vcmp.eq.f32.partialorder %v384_v58, 8.507059e+37  ;;  %v387_v29 = vor.u32 1.1754944e-38, %v386_v61  ;;  %v1503_v35 = vadd.f32 1.0, %v1013_v54 }
  0x3d   :  { %v1025_v33 = vpop.eup %1024  ;;  %873 = vst [vmem:[#allocation5 + $0x40] sm:$0xff] %v833_v23  ;;  %v361_v16 = vmul.f32 %v1023_v26, %v1432_v43  ;;  %1026 = vrcp.f32 %v1489_v24  ;;  %v1505_v36 = vadd.f32 1.0, %v1015_v60  ;;  %v399_v37 = vand.u32 2147483647, %v1489_v24 }
  0x3e   :  { %v376_v38 = vmul.f32 %v1025_v33, %v1442_v50  ;;  %v401_v34 = vand.u32 2147483648, %v1489_v24  ;;  %v1510_v30 = vadd.f32 1.0, %v1017_v7  ;;  %vm366_vm8 = vweird.f32 %v1023_v26 }
  0x3f   :  { %v362_v39 = vsub.f32 1.0, %v361_v16  ;;  %1028 = vrcp.f32 %v1491_v25  ;;  %v1513_v41 = vadd.f32 1.0, %v1019_v10  ;;  %vm381_vm9 = vweird.f32 %v1025_v33  ;;  %vm1523_vm11 = vmor %vm365_vm3, %vm366_vm8 }
  0x40   :  { %v377_v22 = vsub.f32 1.0, %v376_v38  ;;  %v414_v0 = vand.u32 2147483647, %v1491_v25  ;;  %v416_v42 = vand.u32 2147483648, %v1491_v25  ;;  %vm395_vm10 = vweird.f32 %v1489_v24  ;;  %vm1534_vm14 = vmor %vm380_vm5, %vm381_vm9 }
  0x41   :  { %v363_v31 = vmul.f32 %v1023_v26, %v362_v39  ;;  %1030 = vrcp.f32 %v1503_v35  ;;  %v1519_v1 = vadd.f32 1.0, %v1021_v20  ;;  %vm1527_vm12 = vcmp.eq.f32.partialorder %v399_v37, 8.507059e+37 }
  0x42   :  { %v378_v45 = vmul.f32 %v1025_v33, %v377_v22  ;;  %v402_v51 = vor.u32 1.1754944e-38, %v401_v34  ;;  %vm410_vm13 = vweird.f32 %v1491_v25  ;;  %vm425_vm15 = vweird.f32 %v1503_v35 }
  0x43   :  { %v1027_v52 = vpop.eup %1026  ;;  %v364_v47 = vadd.f32 %v1023_v26, %v363_v31  ;;  %v429_v43 = vand.u32 2147483647, %v1503_v35  ;;  %1032 = vrcp.f32 %v1505_v36  ;;  %vm1542_vm0 = vcmp.eq.f32.partialorder %v414_v0, 8.507059e+37 }
  0x44   :  { %v379_v21 = vadd.f32 %v1025_v33, %v378_v45  ;;  %v391_v54 = vmul.f32 %v1027_v52, %v1489_v24  ;;  %v417_v59 = vor.u32 1.1754944e-38, %v416_v42  ;;  %v431_v50 = vand.u32 2147483648, %v1503_v35  ;;  %v1670_v24 = vld [vmem:[#allocation2 + $0xc0] sm:$0xff] }
  0x45   :  { %v1029_v12 = vpop.eup %1028  ;;  %v368_v60 = vsel %vm1523_vm11, %v1023_v26, %v364_v47  ;;  %vm396_vm1 = vweird.f32 %v1027_v52  ;;  %vm440_vm2 = vweird.f32 %v1505_v36  ;;  %v444_v6 = vand.u32 2147483647, %v1505_v36 }
  0x46   :  { %v373_v40 = vsel %vm1493_vm6, %v372_v27, %v368_v60  ;;  %v383_v58 = vsel %vm1534_vm14, %v1025_v33, %v379_v21  ;;  %v392_v61 = vsub.f32 1.0, %v391_v54  ;;  %v406_v7 = vmul.f32 %v1029_v12, %v1491_v25  ;;  %vm1568_vm5 = vmor %vm395_vm10, %vm396_vm1 }
  0x47   :  { %v1031_v62 = vpop.eup %1030  ;;  %v834_v4 = vmul.f32 %v373_v40, %v1354_v48  ;;  %v388_v10 = vsel %vm1497_vm7, %v387_v29, %v383_v58  ;;  %vm411_vm4 = vweird.f32 %v1029_v12  ;;  %vm1559_vm3 = vcmp.eq.f32.partialorder %v429_v43, 8.507059e+37 }
  0x48   :  { %v835_v8 = vmul.f32 %v388_v10, %v1356_v49  ;;  %v393_v20 = vmul.f32 %v1027_v52, %v392_v61  ;;  %v407_v23 = vsub.f32 1.0, %v406_v7  ;;  %v421_v26 = vmul.f32 %v1031_v62, %v1503_v35  ;;  %vm1579_vm7 = vmor %vm410_vm13, %vm411_vm4  ;;  %v1631_v61 = vld [vmem:[#allocation2 + $0xa8] sm:$0xff] }
  0x49   :  { %v1033_v13 = vpop.eup %1032  ;;  %874 = vst [vmem:[#allocation5 + $0x48] sm:$0xff] %v834_v4  ;;  %vm426_vm6 = vweird.f32 %v1031_v62  ;;  %v446_v27 = vand.u32 2147483648, %v1505_v36  ;;  %1034 = vrcp.f32 %v1510_v30  ;;  %v459_v49 = vand.u32 2147483647, %v1510_v30 }
  0x4a   :  { %875 = vst [vmem:[#allocation5 + $0x50] sm:$0xff] %v835_v8  ;;  %v394_v28 = vadd.f32 %v1027_v52, %v393_v20  ;;  %v408_v29 = vmul.f32 %v1029_v12, %v407_v23  ;;  %v422_v33 = vsub.f32 1.0, %v421_v26  ;;  %v436_v16 = vmul.f32 %v1033_v13, %v1505_v36  ;;  %vm1595_vm10 = vmor %vm425_vm15, %vm426_vm6  ;;  %v1641_v8 = vld [vmem:[#allocation2 + $0xb0] sm:$0xff]  ;;  %v1643_v20 = vld [vmem:[#allocation2 + $0xb8] sm:$0xff] }
  0x4b   :  { %v432_v38 = vor.u32 1.1754944e-38, %v431_v50  ;;  %vm441_vm8 = vweird.f32 %v1033_v13  ;;  %vm1583_vm9 = vcmp.eq.f32.partialorder %v444_v6, 8.507059e+37  ;;  %1036 = vrcp.f32 %v1513_v41 }
  0x4c   :  { %v398_v34 = vsel %vm1568_vm5, %v1027_v52, %v394_v28  ;;  %v409_v39 = vadd.f32 %v1029_v12, %v408_v29  ;;  %v423_v22 = vmul.f32 %v1031_v62, %v422_v33  ;;  %v437_v0 = vsub.f32 1.0, %v436_v16  ;;  %vm1613_vm13 = vmor %vm440_vm2, %vm441_vm8 }
  0x4d   :  { %v403_v25 = vsel %vm1527_vm12, %v402_v51, %v398_v34  ;;  %v447_v31 = vor.u32 1.1754944e-38, %v446_v27  ;;  %vm455_vm11 = vweird.f32 %v1510_v30  ;;  %v461_v32 = vand.u32 2147483648, %v1510_v30 }
  0x4e   :  { %v836_v45 = vmul.f32 %v403_v25, %v1371_v55  ;;  %v413_v52 = vsel %vm1579_vm7, %v1029_v12, %v409_v39  ;;  %v424_v47 = vadd.f32 %v1031_v62, %v423_v22  ;;  %v438_v46 = vmul.f32 %v1033_v13, %v437_v0  ;;  %v1677_v39 = vld [vmem:[#allocation2 + $0xc8] sm:$0xff] }
  0x4f   :  { %vm1604_vm12 = vcmp.eq.f32.partialorder %v459_v49, 8.507059e+37  ;;  %v1035_v35 = vpop.eup %1034  ;;  %v418_v53 = vsel %vm1542_vm0, %v417_v59, %v413_v52  ;;  %v474_v55 = vand.u32 2147483647, %v1513_v41  ;;  %v476_v21 = vand.u32 2147483648, %v1513_v41 }
  0x50   :  { %1038 = vrcp.f32 %v1519_v1  ;;  %876 = vst [vmem:[#allocation5 + $0x58] sm:$0xff] %v836_v45  ;;  %v837_v54 = vmul.f32 %v418_v53, %v1392_v63  ;;  %v428_v57 = vsel %vm1595_vm10, %v1031_v62, %v424_v47  ;;  %v439_v59 = vadd.f32 %v1033_v13, %v438_v46 }
  0x51   :  { %v451_v50 = vmul.f32 %v1035_v35, %v1510_v30  ;;  %v1037_v36 = vpop.eup %1036  ;;  %v433_v12 = vsel %vm1559_vm3, %v432_v38, %v428_v57  ;;  %vm456_vm14 = vweird.f32 %v1035_v35  ;;  %v462_v60 = vor.u32 1.1754944e-38, %v461_v32 }
  0x52   :  { %vm470_vm15 = vweird.f32 %v1513_v41  ;;  %877 = vst [vmem:[#allocation5 + $0x60] sm:$0xff] %v837_v54  ;;  %v838_v6 = vmul.f32 %v433_v12, %v1394_v3  ;;  %v443_v63 = vsel %vm1613_vm13, %v1033_v13, %v439_v59  ;;  %v466_v58 = vmul.f32 %v1037_v36, %v1513_v41  ;;  %vm1648_vm2 = vmor %vm455_vm11, %vm456_vm14 }
  0x53   :  { %v452_v40 = vsub.f32 1.0, %v451_v50  ;;  %v448_v7 = vsel %vm1583_vm9, %v447_v31, %v443_v63  ;;  %vm471_vm0 = vweird.f32 %v1037_v36  ;;  %vm1635_vm1 = vcmp.eq.f32.partialorder %v474_v55, 8.507059e+37 }
  0x54   :  { %v477_v4 = vor.u32 1.1754944e-38, %v476_v21  ;;  %878 = vst [vmem:[#allocation5 + $0x68] sm:$0xff] %v838_v6  ;;  %v839_v3 = vmul.f32 %v448_v7, %v1400_v11  ;;  %v467_v15 = vsub.f32 1.0, %v466_v58  ;;  %1040 = vpow2.f32 %v1475_v5  ;;  %vm1661_vm3 = vmor %vm470_vm15, %vm471_vm0 }
  0x55   :  { %v453_v10 = vmul.f32 %v1035_v35, %v452_v40  ;;  %vm485_vm4 = vweird.f32 %v1519_v1  ;;  %v489_v11 = vand.u32 2147483647, %v1519_v1  ;;  %1042 = vpow2.f32 %v1478_v9 }
  0x56   :  { %v1039_v23 = vpop.eup %1038  ;;  %v945_v5 = vmul.f32 -1.442695, %v1631_v61  ;;  %879 = vst [vmem:[#allocation5 + $0x70] sm:$0xff] %v839_v3  ;;  %v468_v48 = vmul.f32 %v1037_v36, %v467_v15  ;;  %v491_v49 = vand.u32 2147483648, %v1519_v1  ;;  %1044 = vpow2.f32 %v1485_v19 }
  0x57   :  { %v454_v13 = vadd.f32 %v1035_v35, %v453_v10  ;;  %v481_v27 = vmul.f32 %v1039_v23, %v1519_v1  ;;  %vm486_vm5 = vweird.f32 %v1039_v23  ;;  %v946_v9 = vmul.f32 -1.442695, %v1641_v8 }
  0x58   :  { %v947_v28 = vmul.f32 -1.442695, %v1643_v20  ;;  %v469_v33 = vadd.f32 %v1037_v36, %v468_v48  ;;  %1046 = vpow2.f32 %v945_v5  ;;  %vm1684_vm6 = vmor %vm485_vm4, %vm486_vm5  ;;  %v492_v42 = vor.u32 1.1754944e-38, %v491_v49 }
  0x59   :  { %v458_v29 = vsel %vm1648_vm2, %v1035_v35, %v454_v13  ;;  %v482_v16 = vsub.f32 1.0, %v481_v27  ;;  %1048 = vpow2.f32 %v946_v9  ;;  %v948_v31 = vmul.f32 -1.442695, %v1670_v24 }
  0x5a   :  { %v463_v41 = vsel %vm1604_vm12, %v462_v60, %v458_v29  ;;  %v1041_v38 = vpop.eup %1040  ;;  %v473_v19 = vsel %vm1661_vm3, %v1037_v36, %v469_v33  ;;  %1050 = vpow2.f32 %v947_v28  ;;  %vm490_vm7 = vcmp.eq.f32.partialorder %v489_v11, 8.507059e+37 }
  0x5b   :  { %v840_v37 = vmul.f32 %v463_v41, %v1402_v14  ;;  %v483_v34 = vmul.f32 %v1039_v23, %v482_v16  ;;  %v1043_v22 = vpop.eup %1042  ;;  %v478_v0 = vsel %vm1635_vm1, %v477_v4, %v473_v19  ;;  %v1688_v14 = vadd.f32 1.0, %v1041_v38  ;;  %v1936_v41 = vld [vmem:[#allocation2 + $0x130] sm:$0x7] }
  0x5c   :  { %v841_v32 = vmul.f32 %v478_v0, %v1406_v17  ;;  %v1692_v52 = vadd.f32 1.0, %v1043_v22  ;;  %v1045_v47 = vpop.eup %1044  ;;  %v949_v1 = vmul.f32 -1.442695, %v1677_v39  ;;  %v1701_v17 = vld [vmem:[#allocation2 + $0xd0] sm:$0xff] }
  0x5d   :  { %880 = vst [vmem:[#allocation5 + $0x78] sm:$0xff] %v840_v37  ;;  %v484_v45 = vadd.f32 %v1039_v23, %v483_v34  ;;  %1052 = vrcp.f32 %v1688_v14  ;;  %v504_v35 = vand.u32 2147483647, %v1688_v14  ;;  %v506_v53 = vand.u32 2147483648, %v1688_v14 }
  0x5e   :  { %v1047_v46 = vpop.eup %1046  ;;  %881 = vst [vmem:[#allocation5 + $0x80] sm:$0xff] %v841_v32  ;;  %1054 = vrcp.f32 %v1692_v52  ;;  %v519_v21 = vand.u32 2147483647, %v1692_v52  ;;  %v521_v59 = vand.u32 2147483648, %v1692_v52  ;;  %v1706_v50 = vadd.f32 1.0, %v1045_v47 }
  0x5f   :  { %v488_v51 = vsel %vm1684_vm6, %v1039_v23, %v484_v45  ;;  %v1049_v43 = vpop.eup %1048  ;;  %1056 = vpow2.f32 %v948_v31  ;;  %v1708_v36 = vadd.f32 1.0, %v1047_v46  ;;  %vm500_vm8 = vweird.f32 %v1688_v14 }
  0x60   :  { %v493_v55 = vsel %vm490_vm7, %v492_v42, %v488_v51  ;;  %v1051_v54 = vpop.eup %1050  ;;  %vm515_vm9 = vweird.f32 %v1692_v52  ;;  %1058 = vpow2.f32 %v949_v1  ;;  %v950_v12 = vmul.f32 -1.442695, %v1701_v17 }
  0x61   :  { %v842_v57 = vmul.f32 %v493_v55, %v1408_v18  ;;  %vm1713_vm10 = vcmp.eq.f32.partialorder %v504_v35, 8.507059e+37  ;;  %v507_v6 = vor.u32 1.1754944e-38, %v506_v53  ;;  %1060 = vrcp.f32 %v1706_v50 }
  0x62   :  { %v536_v18 = vand.u32 2147483648, %v1706_v50  ;;  %v1719_v63 = vadd.f32 1.0, %v1049_v43  ;;  %vm1721_vm11 = vcmp.eq.f32.partialorder %v519_v21, 8.507059e+37  ;;  %v534_v7 = vand.u32 2147483647, %v1706_v50 }
  0x63   :  { %882 = vst [vmem:[#allocation5 + $0x88] sm:$0xff] %v842_v57  ;;  %v1053_v40 = vpop.eup %1052  ;;  %1062 = vrcp.f32 %v1708_v36  ;;  %v1727_v62 = vadd.f32 1.0, %v1051_v54  ;;  %v522_v10 = vor.u32 1.1754944e-38, %v521_v59  ;;  %v549_v15 = vand.u32 2147483647, %v1708_v36 }
  0x64   :  { %v1055_v4 = vpop.eup %1054  ;;  %v496_v3 = vmul.f32 %v1053_v40, %v1688_v14  ;;  %v551_v23 = vand.u32 2147483648, %v1708_v36  ;;  %vm530_vm12 = vweird.f32 %v1706_v50  ;;  %vm545_vm13 = vweird.f32 %v1708_v36 }
  0x65   :  { %v1057_v26 = vpop.eup %1056  ;;  %v511_v11 = vmul.f32 %v1055_v4, %v1692_v52  ;;  %1064 = vpow2.f32 %v950_v12  ;;  %vm501_vm14 = vweird.f32 %v1053_v40  ;;  %v537_v13 = vor.u32 1.1754944e-38, %v536_v18 }
  0x66   :  { %v497_v5 = vsub.f32 1.0, %v496_v3  ;;  %1066 = vrcp.f32 %v1719_v63  ;;  %v1059_v48 = vpop.eup %1058  ;;  %vm516_vm15 = vweird.f32 %v1055_v4  ;;  %vm1736_vm0 = vcmp.eq.f32.partialorder %v534_v7, 8.507059e+37  ;;  %vm1750_vm4 = vmor %vm500_vm8, %vm501_vm14 }
  0x67   :  { %v512_v27 = vsub.f32 1.0, %v511_v11  ;;  %v564_v30 = vand.u32 2147483647, %v1719_v63  ;;  %1068 = vrcp.f32 %v1727_v62  ;;  %v1061_v9 = vpop.eup %1060  ;;  %vm1742_vm1 = vcmp.eq.f32.partialorder %v549_v15, 8.507059e+37  ;;  %vm1760_vm5 = vmor %vm515_vm9, %vm516_vm15 }
  0x68   :  { %v498_v28 = vmul.f32 %v1053_v40, %v497_v5  ;;  %v552_v33 = vor.u32 1.1754944e-38, %v551_v23  ;;  %vm560_vm2 = vweird.f32 %v1719_v63  ;;  %v526_v37 = vmul.f32 %v1061_v9, %v1706_v50 }
  0x69   :  { %v1063_v16 = vpop.eup %1062  ;;  %v513_v38 = vmul.f32 %v1055_v4, %v512_v27  ;;  %v566_v19 = vand.u32 2147483648, %v1719_v63  ;;  %vm575_vm3 = vweird.f32 %v1727_v62  ;;  %v579_v25 = vand.u32 2147483647, %v1727_v62 }
  0x6a   :  { %v499_v34 = vadd.f32 %v1053_v40, %v498_v28  ;;  %v541_v0 = vmul.f32 %v1063_v16, %v1708_v36  ;;  %v581_v42 = vand.u32 2147483648, %v1727_v62  ;;  %v527_v32 = vsub.f32 1.0, %v526_v37  ;;  %v1849_v37 = vld [vmem:[#allocation2 + $0xe8] sm:$0xff] }
  0x6b   :  { %v1065_v14 = vpop.eup %1064  ;;  %v514_v31 = vadd.f32 %v1055_v4, %v513_v38  ;;  %vm531_vm6 = vweird.f32 %v1061_v9  ;;  %vm546_vm7 = vweird.f32 %v1063_v16  ;;  %vm1767_vm8 = vcmp.eq.f32.partialorder %v564_v30, 8.507059e+37  ;;  %v1847_v38 = vld [vmem:[#allocation2 + $0xe0] sm:$0xff] }
  0x6c   :  { %v1067_v52 = vpop.eup %1066  ;;  %v503_v47 = vsel %vm1750_vm4, %v1053_v40, %v499_v34  ;;  %v542_v1 = vsub.f32 1.0, %v541_v0  ;;  %v1773_v46 = vadd.f32 1.0, %v1057_v26  ;;  %v1775_v51 = vadd.f32 1.0, %v1059_v48  ;;  %vm1788_vm9 = vmor %vm530_vm12, %vm531_vm6  ;;  %v1822_v48 = vld [vmem:[#allocation2 + $0xd8] sm:$0xff]  ;;  %v1853_v0 = vld [vmem:[#allocation2 + $0xf0] sm:$0xff] }
  0x6d   :  { %v1069_v35 = vpop.eup %1068  ;;  %v508_v53 = vsel %vm1713_vm10, %v507_v6, %v503_v47  ;;  %v518_v43 = vsel %vm1760_vm5, %v1055_v4, %v514_v31  ;;  %v528_v55 = vmul.f32 %v1061_v9, %v527_v32  ;;  %v556_v21 = vmul.f32 %v1067_v52, %v1719_v63  ;;  %vm1796_vm14 = vmor %vm545_vm13, %vm546_vm7  ;;  %v1857_v31 = vld [vmem:[#allocation2 + $0xf8] sm:$0xff]  ;;  %v1916_v63 = vld [vmem:[#allocation2 + $0x120] sm:$0x7] }
  0x6e   :  { %v843_v54 = vmul.f32 %v508_v53, %v1453_v56  ;;  %v523_v57 = vsel %vm1721_vm11, %v522_v10, %v518_v43  ;;  %v543_v12 = vmul.f32 %v1063_v16, %v542_v1  ;;  %vm561_vm10 = vweird.f32 %v1067_v52 }
  0x6f   :  { %v844_v60 = vmul.f32 %v523_v57, %v1455_v2  ;;  %v529_v6 = vadd.f32 %v1061_v9, %v528_v55  ;;  %v557_v18 = vsub.f32 1.0, %v556_v21  ;;  %v571_v40 = vmul.f32 %v1069_v35, %v1727_v62  ;;  %vm1813_vm12 = vmor %vm560_vm2, %vm561_vm10 }
  0x70   :  { %883 = vst [vmem:[#allocation5 + $0x90] sm:$0xff] %v843_v54  ;;  %v544_v50 = vadd.f32 %v1063_v16, %v543_v12  ;;  %v567_v58 = vor.u32 1.1754944e-38, %v566_v19  ;;  %1070 = vrcp.f32 %v1773_v46  ;;  %v1802_v7 = vadd.f32 1.0, %v1065_v14  ;;  %v1879_v12 = vld [vmem:[#allocation2 + $0x108] sm:$0xff] }
  0x71   :  { %884 = vst [vmem:[#allocation5 + $0x98] sm:$0xff] %v844_v60  ;;  %v533_v2 = vsel %vm1788_vm9, %v1061_v9, %v529_v6  ;;  %v558_v4 = vmul.f32 %v1067_v52, %v557_v18  ;;  %v572_v36 = vsub.f32 1.0, %v571_v40  ;;  %vm576_vm11 = vweird.f32 %v1069_v35 }
  0x72   :  { %v538_v3 = vsel %vm1736_vm0, %v537_v13, %v533_v2  ;;  %v548_v10 = vsel %vm1796_vm14, %v1063_v16, %v544_v50  ;;  %v594_v23 = vand.u32 2147483647, %v1773_v46  ;;  %1072 = vrcp.f32 %v1775_v51  ;;  %vm1827_vm13 = vmor %vm575_vm3, %vm576_vm11 }
  0x73   :  { %v845_v26 = vmul.f32 %v538_v3, %v1463_v44  ;;  %v553_v11 = vsel %vm1742_vm1, %v552_v33, %v548_v10  ;;  %v559_v5 = vadd.f32 %v1067_v52, %v558_v4  ;;  %v573_v13 = vmul.f32 %v1069_v35, %v572_v36  ;;  %v1894_v36 = vld [vmem:[#allocation2 + $0x110] sm:$0xff] }
  0x74   :  { %v846_v27 = vmul.f32 %v553_v11, %v1631_v61  ;;  %v582_v49 = vor.u32 1.1754944e-38, %v581_v42  ;;  %v596_v30 = vand.u32 2147483648, %v1773_v46  ;;  %vm580_vm15 = vcmp.eq.f32.partialorder %v579_v25, 8.507059e+37 }
  0x75   :  { %885 = vst [vmem:[#allocation5 + $0xa0] sm:$0xff] %v845_v26  ;;  %v563_v44 = vsel %vm1813_vm12, %v1067_v52, %v559_v5  ;;  %v574_v9 = vadd.f32 %v1069_v35, %v573_v13  ;;  %vm590_vm0 = vweird.f32 %v1773_v46  ;;  %1074 = vrcp.f32 %v1802_v7  ;;  %v1901_v26 = vld [vmem:[#allocation2 + $0x118] sm:$0xff] }
  0x76   :  { %v1071_v28 = vpop.eup %1070  ;;  %886 = vst [vmem:[#allocation5 + $0xa8] sm:$0xff] %v846_v27  ;;  %v568_v61 = vsel %vm1767_vm8, %v567_v58, %v563_v44  ;;  %v951_v62 = vmul.f32 -1.442695, %v1822_v48  ;;  %vm1843_vm1 = vcmp.eq.f32.partialorder %v594_v23, 8.507059e+37  ;;  %v597_v22 = vor.u32 1.1754944e-38, %v596_v30 }
  0x77   :  { %v847_v29 = vmul.f32 %v568_v61, %v1641_v8  ;;  %v578_v33 = vsel %vm1827_vm13, %v1069_v35, %v574_v9  ;;  %v586_v16 = vmul.f32 %v1071_v28, %v1773_v46  ;;  %vm605_vm2 = vweird.f32 %v1775_v51  ;;  %v1877_v46 = vld [vmem:[#allocation2 + $0x100] sm:$0xff] }
  0x78   :  { %v1073_v19 = vpop.eup %1072  ;;  %v583_v34 = vsel %vm580_vm15, %v582_v49, %v578_v33  ;;  %v609_v8 = vand.u32 2147483647, %v1775_v51  ;;  %vm591_vm4 = vweird.f32 %v1071_v28  ;;  %v611_v32 = vand.u32 2147483648, %v1775_v51 }
  0x79   :  { %887 = vst [vmem:[#allocation5 + $0xb0] sm:$0xff] %v847_v29  ;;  %v848_v25 = vmul.f32 %v583_v34, %v1643_v20  ;;  %v587_v42 = vsub.f32 1.0, %v586_v16  ;;  %v601_v14 = vmul.f32 %v1073_v19, %v1775_v51  ;;  %1076 = vpow2.f32 %v951_v62  ;;  %vm1865_vm5 = vmor %vm590_vm0, %vm591_vm4 }
  0x7a   :  { %v952_v45 = vmul.f32 -1.442695, %v1847_v38  ;;  %v953_v52 = vmul.f32 -1.442695, %v1849_v37  ;;  %vm606_vm3 = vweird.f32 %v1073_v19  ;;  %v954_v35 = vmul.f32 -1.442695, %v1853_v0 }
  0x7b   :  { %888 = vst [vmem:[#allocation5 + $0xb8] sm:$0xff] %v848_v25  ;;  %v588_v47 = vmul.f32 %v1071_v28, %v587_v42  ;;  %v602_v1 = vsub.f32 1.0, %v601_v14  ;;  %v1075_v20 = vpop.eup %1074  ;;  %vm620_vm6 = vweird.f32 %v1802_v7  ;;  %v624_v43 = vand.u32 2147483647, %v1802_v7  ;;  %vm1883_vm8 = vmor %vm605_vm2, %vm606_vm3 }
  0x7c   :  { %1078 = vpow2.f32 %v952_v45  ;;  %v955_v55 = vmul.f32 -1.442695, %v1857_v31  ;;  %vm1872_vm7 = vcmp.eq.f32.partialorder %v609_v8, 8.507059e+37  ;;  %v616_v59 = vmul.f32 %v1075_v20, %v1802_v7 }
  0x7d   :  { %v589_v21 = vadd.f32 %v1071_v28, %v588_v47  ;;  %v603_v54 = vmul.f32 %v1073_v19, %v602_v1  ;;  %v612_v6 = vor.u32 1.1754944e-38, %v611_v32  ;;  %vm621_vm9 = vweird.f32 %v1075_v20 }
  0x7e   :  { %v626_v56 = vand.u32 2147483648, %v1802_v7  ;;  %1080 = vpow2.f32 %v953_v52  ;;  %v617_v50 = vsub.f32 1.0, %v616_v59  ;;  %v956_v51 = vmul.f32 -1.442695, %v1877_v46  ;;  %vm1908_vm10 = vmor %vm620_vm6, %vm621_vm9  ;;  %v1921_v7 = vld [vmem:[#allocation2 + $0x128] sm:$0x7] }
  0x7f   :  { %v593_v18 = vsel %vm1865_vm5, %v1071_v28, %v589_v21  ;;  %v604_v40 = vadd.f32 %v1073_v19, %v603_v54  ;;  %1082 = vpow2.f32 %v954_v35  ;;  %v1077_v58 = vpop.eup %1076  ;;  %v957_v4 = vmul.f32 -1.442695, %v1879_v12 }
  0x80   :  { %v598_v2 = vsel %vm1843_vm1, %v597_v22, %v593_v18  ;;  %1084 = vpow2.f32 %v955_v55  ;;  %v618_v15 = vmul.f32 %v1075_v20, %v617_v50  ;;  %v1899_v23 = vadd.f32 1.0, %v1077_v58 }
  0x81   :  { %v849_v3 = vmul.f32 %v598_v2, %v1670_v24  ;;  %v608_v10 = vsel %vm1883_vm8, %v1073_v19, %v604_v40  ;;  %vm1912_vm14 = vcmp.eq.f32.partialorder %v624_v43, 8.507059e+37  ;;  %v627_v27 = vor.u32 1.1754944e-38, %v626_v56 }
  0x82   :  { %v1079_v11 = vpop.eup %1078  ;;  %v613_v5 = vsel %vm1872_vm7, %v612_v6, %v608_v10  ;;  %v619_v30 = vadd.f32 %v1075_v20, %v618_v15  ;;  %1086 = vrcp.f32 %v1899_v23  ;;  %v958_v44 = vmul.f32 -1.442695, %v1894_v36 }
  0x83   :  { %889 = vst [vmem:[#allocation5 + $0xc0] sm:$0xff] %v849_v3  ;;  %v850_v49 = vmul.f32 %v613_v5, %v1677_v39  ;;  %v639_v28 = vand.u32 2147483647, %v1899_v23  ;;  %v1924_v61 = vadd.f32 1.0, %v1079_v11  ;;  %1088 = vpow2.f32 %v956_v51 }
  0x84   :  { %v1081_v9 = vpop.eup %1080  ;;  %v1927_v62 = vmul.f32 -1.442695, %v1901_v26  ;;  %v623_v39 = vsel %vm1908_vm10, %v1075_v20, %v619_v30  ;;  %1090 = vpow2.f32 %v957_v4  ;;  %v1934_v16 = vmul.f32 -1.442695, %v1916_v63 }
  0x85   :  { %v1083_v29 = vpop.eup %1082  ;;  %890 = vst [vmem:[#allocation5 + $0xc8] sm:$0xff] %v850_v49  ;;  %v1931_v33 = vadd.f32 1.0, %v1081_v9  ;;  %v628_v34 = vsel %vm1912_vm14, %v627_v27, %v623_v39  ;;  %v641_v22 = vand.u32 2147483648, %v1899_v23  ;;  %1092 = vrcp.f32 %v1924_v61 }
  0x86   :  { %v1085_v19 = vpop.eup %1084  ;;  %v1943_v8 = vmul.f32 -1.442695, %v1921_v7  ;;  %v851_v25 = vmul.f32 %v628_v34, %v1701_v17  ;;  %v654_v42 = vand.u32 2147483647, %v1924_v61  ;;  %v656_v14 = vand.u32 2147483648, %v1924_v61 }
  0x87   :  { %1094 = vpow2.f32 %v958_v44  ;;  %vm635_vm11 = vweird.f32 %v1899_v23  ;;  %vm1949_vm12 = vcmp.eq.f32.partialorder %v639_v28, 8.507059e+37  ;;  %v1955_v45 = vmul.f32 -1.442695, %v1936_v41 }
  0x88   :  { %1096 = vrcp.f32 %v1931_v33  ;;  %v1087_v52 = vpop.eup %1086  ;;  %891 = vst [vmem:[#allocation5 + $0xd0] sm:$0xff] %v851_v25  ;;  %v669_v17 = vand.u32 2147483647, %v1931_v33  ;;  %v671_v47 = vand.u32 2147483648, %v1931_v33  ;;  %v1959_v1 = vadd.f32 1.0, %v1083_v29 }
  0x89   :  { %v1961_v35 = vadd.f32 1.0, %v1085_v19  ;;  %v1089_v20 = vpop.eup %1088  ;;  %v631_v53 = vmul.f32 %v1087_v52, %v1899_v23  ;;  %v642_v43 = vor.u32 1.1754944e-38, %v641_v22  ;;  %vm650_vm13 = vweird.f32 %v1924_v61 }
  0x8a   :  { %vm665_vm15 = vweird.f32 %v1931_v33  ;;  %v1091_v55 = vpop.eup %1090  ;;  %vm636_vm0 = vweird.f32 %v1087_v52  ;;  %vm1966_vm1 = vcmp.eq.f32.partialorder %v654_v42, 8.507059e+37  ;;  %v657_v54 = vor.u32 1.1754944e-38, %v656_v14 }
  0x8b   :  { %1098 = vrcp.f32 %v1959_v1  ;;  %v1093_v57 = vpop.eup %1092  ;;  %v632_v59 = vsub.f32 1.0, %v631_v53  ;;  %v684_v60 = vand.u32 2147483647, %v1959_v1  ;;  %v686_v6 = vand.u32 2147483648, %v1959_v1  ;;  %vm1990_vm5 = vmor %vm635_vm11, %vm636_vm0 }
  0x8c   :  { %1100 = vrcp.f32 %v1961_v35  ;;  %v646_v18 = vmul.f32 %v1093_v57, %v1924_v61  ;;  %vm1977_vm2 = vcmp.eq.f32.partialorder %v669_v17, 8.507059e+37  ;;  %v672_v50 = vor.u32 1.1754944e-38, %v671_v47 }
  0x8d   :  { %v1974_v56 = vpop.eup %1094  ;;  %vm680_vm4 = vweird.f32 %v1959_v1  ;;  %v699_v58 = vand.u32 2147483647, %v1961_v35  ;;  %v633_v51 = vmul.f32 %v1087_v52, %v632_v59  ;;  %vm695_vm3 = vweird.f32 %v1961_v35 }
  0x8e   :  { %v1097_v2 = vpop.eup %1096  ;;  %v701_v4 = vand.u32 2147483648, %v1961_v35  ;;  %v1985_v3 = vadd.f32 1.0, %v1089_v20  ;;  %v647_v15 = vsub.f32 1.0, %v646_v18  ;;  %vm651_vm6 = vweird.f32 %v1093_v57 }
  0x8f   :  { %v661_v11 = vmul.f32 %v1097_v2, %v1931_v33  ;;  %v1995_v5 = vadd.f32 1.0, %v1091_v55  ;;  %v634_v13 = vadd.f32 %v1087_v52, %v633_v51  ;;  %vm1997_vm7 = vcmp.eq.f32.partialorder %v684_v60, 8.507059e+37  ;;  %vm2011_vm10 = vmor %vm650_vm13, %vm651_vm6 }
  0x90   :  { %v687_v27 = vor.u32 1.1754944e-38, %v686_v6  ;;  %1102 = vrcp.f32 %v1985_v3  ;;  %v648_v23 = vmul.f32 %v1093_v57, %v647_v15  ;;  %vm666_vm8 = vweird.f32 %v1097_v2 }
  0x91   :  { %v1099_v49 = vpop.eup %1098  ;;  %v662_v30 = vsub.f32 1.0, %v661_v11  ;;  %vm2002_vm9 = vcmp.eq.f32.partialorder %v699_v58, 8.507059e+37  ;;  %v702_v9 = vor.u32 1.1754944e-38, %v701_v4  ;;  %v638_v29 = vsel %vm1990_vm5, %v1087_v52, %v634_v13  ;;  %vm2024_vm11 = vmor %vm665_vm15, %vm666_vm8  ;;  %v2065_v13 = vld [vmem:[#allocation2 + $0x138] sm:$0x7] }
  0x92   :  { %v1101_v28 = vpop.eup %1100  ;;  %v676_v19 = vmul.f32 %v1099_v49, %v1959_v1  ;;  %vm710_vm14 = vweird.f32 %v1985_v3  ;;  %1104 = vrcp.f32 %v1995_v5  ;;  %v643_v34 = vsel %vm1949_vm12, %v642_v43, %v638_v29 }
  0x93   :  { %v649_v22 = vadd.f32 %v1093_v57, %v648_v23  ;;  %v663_v25 = vmul.f32 %v1097_v2, %v662_v30  ;;  %v691_v42 = vmul.f32 %v1101_v28, %v1961_v35  ;;  %v852_v14 = vmul.f32 %v643_v34, %v1822_v48 }
  0x94   :  { %v677_v52 = vsub.f32 1.0, %v676_v19  ;;  %vm681_vm13 = vweird.f32 %v1099_v49  ;;  %v714_v17 = vand.u32 2147483647, %v1985_v3  ;;  %vm696_vm12 = vweird.f32 %v1101_v28 }
  0x95   :  { %v653_v32 = vsel %vm2011_vm10, %v1093_v57, %v649_v22  ;;  %v664_v47 = vadd.f32 %v1097_v2, %v663_v25  ;;  %v692_v20 = vsub.f32 1.0, %v691_v42  ;;  %892 = vst [vmem:[#allocation5 + $0xd8] sm:$0xff] %v852_v14  ;;  %v716_v43 = vand.u32 2147483648, %v1985_v3  ;;  %vm2040_vm0 = vmor %vm680_vm4, %vm681_vm13 }
  0x96   :  { %v1103_v53 = vpop.eup %1102  ;;  %v658_v48 = vsel %vm1966_vm1, %v657_v54, %v653_v32  ;;  %v678_v33 = vmul.f32 %v1099_v49, %v677_v52  ;;  %vm725_vm15 = vweird.f32 %v1995_v5  ;;  %vm2050_vm1 = vmor %vm695_vm3, %vm696_vm12  ;;  %v729_v1 = vand.u32 2147483647, %v1995_v5 }
  0x97   :  { %v853_v55 = vmul.f32 %v658_v48, %v1847_v38  ;;  %v668_v59 = vsel %vm2024_vm11, %v1097_v2, %v664_v47  ;;  %v693_v60 = vmul.f32 %v1101_v28, %v692_v20  ;;  %v706_v21 = vmul.f32 %v1103_v53, %v1985_v3 }
  0x98   :  { %v1105_v54 = vpop.eup %1104  ;;  %v673_v6 = vsel %vm1977_vm2, %v672_v50, %v668_v59  ;;  %v679_v18 = vadd.f32 %v1099_v49, %v678_v33  ;;  %vm711_vm5 = vweird.f32 %v1103_v53  ;;  %v731_v35 = vand.u32 2147483648, %v1995_v5 }
  0x99   :  { %893 = vst [vmem:[#allocation5 + $0xe0] sm:$0xff] %v853_v55  ;;  %v854_v58 = vmul.f32 %v673_v6, %v1849_v37  ;;  %v694_v2 = vadd.f32 %v1101_v28, %v693_v60  ;;  %v707_v51 = vsub.f32 1.0, %v706_v21  ;;  %v721_v4 = vmul.f32 %v1105_v54, %v1995_v5  ;;  %vm2073_vm4 = vmor %vm710_vm14, %vm711_vm5 }
  0x9a   :  { %v683_v40 = vsel %vm2040_vm0, %v1099_v49, %v679_v18  ;;  %vm726_vm2 = vweird.f32 %v1105_v54  ;;  %v219_v50 = vadd.f32 1.0, %v1974_v56  ;;  %v717_v24 = vor.u32 1.1754944e-38, %v716_v43 }
  0x9b   :  { %894 = vst [vmem:[#allocation5 + $0xe8] sm:$0xff] %v854_v58  ;;  %v688_v10 = vsel %vm1997_vm7, %v687_v27, %v683_v40  ;;  %v698_v15 = vsel %vm2050_vm1, %v1101_v28, %v694_v2  ;;  %v708_v37 = vmul.f32 %v1103_v53, %v707_v51  ;;  %v722_v11 = vsub.f32 1.0, %v721_v4  ;;  %vm2081_vm6 = vmor %vm725_vm15, %vm726_vm2 }
  0x9c   :  { %v855_v23 = vmul.f32 %v688_v10, %v1853_v0  ;;  %v703_v49 = vsel %vm2002_vm9, %v702_v9, %v698_v15  ;;  %1106 = vrcp.f32 %v219_v50  ;;  %vm715_vm3 = vcmp.eq.f32.partialorder %v714_v17, 8.507059e+37 }
  0x9d   :  { %v856_v27 = vmul.f32 %v703_v49, %v1857_v31  ;;  %v709_v30 = vadd.f32 %v1103_v53, %v708_v37  ;;  %v723_v28 = vmul.f32 %v1105_v54, %v722_v11  ;;  %v732_v3 = vor.u32 1.1754944e-38, %v731_v35 }
  0x9e   :  { %895 = vst [vmem:[#allocation5 + $0xf0] sm:$0xff] %v855_v23  ;;  %1108 = vpow2.f32 %v1927_v62  ;;  %v963_v44 = vmul.f32 -1.442695, %v2065_v13  ;;  %vm730_vm7 = vcmp.eq.f32.partialorder %v729_v1, 8.507059e+37  ;;  %vm740_vm8 = vweird.f32 %v219_v50 }
  0x9f   :  { %896 = vst [vmem:[#allocation5 + $0xf8] sm:$0xff] %v856_v27  ;;  %v713_v31 = vsel %vm2073_vm4, %v1103_v53, %v709_v30  ;;  %v724_v9 = vadd.f32 %v1105_v54, %v723_v28  ;;  %1110 = vpow2.f32 %v1934_v16  ;;  %v746_v16 = vand.u32 2147483648, %v219_v50 }
  0xa0   :  { %v718_v29 = vsel %vm715_vm3, %v717_v24, %v713_v31  ;;  %1112 = vpow2.f32 %v1943_v8 }
  0xa1   :  { %v857_v5 = vmul.f32 %v718_v29, %v1877_v46  ;;  %v728_v39 = vsel %vm2081_vm6, %v1105_v54, %v724_v9  ;;  %1114 = vpow2.f32 %v1955_v45  ;;  %v744_v46 = vand.u32 2147483647, %v219_v50 }
  0xa2   :  { %v1107_v62 = vpop.eup %1106  ;;  %v733_v19 = vsel %vm730_vm7, %v732_v3, %v728_v39  ;;  %1116 = vpow2.f32 %v963_v44  ;;  %v747_v32 = vor.u32 1.1754944e-38, %v746_v16 }
  0xa3   :  { %897 = vst [vmem:[#allocation5 + $0x100] sm:$0xff] %v857_v5  ;;  %v858_v34 = vmul.f32 %v733_v19, %v1879_v12  ;;  %v736_v22 = vmul.f32 %v1107_v62, %v219_v50  ;;  %vm741_vm9 = vweird.f32 %v1107_v62  ;;  %vm745_vm14 = vcmp.eq.f32.partialorder %v744_v46, 8.507059e+37 }
  0xa4   :  { %v1109_v25 = vpop.eup %1108  ;;  %vm742_vm10 = vmor %vm740_vm8, %vm741_vm9 }
  0xa5   :  { %v1111_v42 = vpop.eup %1110  ;;  %898 = vst [vmem:[#allocation5 + $0x108] sm:$0xff] %v858_v34  ;;  %v737_v8 = vsub.f32 1.0, %v736_v22  ;;  %v220_v14 = vadd.f32 1.0, %v1109_v25 }
  0xa6   :  { %v1113_v61 = vpop.eup %1112  ;;  %v221_v52 = vadd.f32 1.0, %v1111_v42 }
  0xa7   :  { %v1115_v17 = vpop.eup %1114  ;;  %v738_v45 = vmul.f32 %v1107_v62, %v737_v8  ;;  %1118 = vrcp.f32 %v220_v14  ;;  %v222_v20 = vadd.f32 1.0, %v1113_v61  ;;  %v759_v53 = vand.u32 2147483647, %v220_v14 }
  0xa8   :  { %1120 = vrcp.f32 %v221_v52  ;;  %v1117_v12 = vpop.eup %1116  ;;  %v761_v48 = vand.u32 2147483648, %v220_v14  ;;  %v223_v33 = vadd.f32 1.0, %v1115_v17  ;;  %v774_v55 = vand.u32 2147483647, %v221_v52 }
  0xa9   :  { %v739_v47 = vadd.f32 %v1107_v62, %v738_v45  ;;  %1122 = vrcp.f32 %v222_v20  ;;  %v2096_v57 = vadd.f32 1.0, %v1117_v12  ;;  %vm755_vm11 = vweird.f32 %v220_v14 }
  0xaa   :  { %1124 = vrcp.f32 %v223_v33  ;;  %v776_v54 = vand.u32 2147483648, %v221_v52  ;;  %vm2099_vm13 = vcmp.eq.f32.partialorder %v759_v53, 8.507059e+37  ;;  %v762_v1 = vor.u32 1.1754944e-38, %v761_v48 }
  0xab   :  { %v743_v43 = vsel %vm742_vm10, %v1107_v62, %v739_v47  ;;  %vm770_vm12 = vweird.f32 %v221_v52  ;;  %vm2103_vm15 = vcmp.eq.f32.partialorder %v774_v55, 8.507059e+37  ;;  %v789_v51 = vand.u32 2147483647, %v222_v20 }
  0xac   :  { %v748_v59 = vsel %vm745_vm14, %v747_v32, %v743_v43  ;;  %v791_v4 = vand.u32 2147483648, %v222_v20  ;;  %1126 = vrcp.f32 %v2096_v57  ;;  %v777_v10 = vor.u32 1.1754944e-38, %v776_v54 }
  0xad   :  { %v1119_v60 = vpop.eup %1118  ;;  %v859_v21 = vmul.f32 %v748_v59, %v1894_v36  ;;  %v804_v36 = vand.u32 2147483647, %v223_v33  ;;  %v806_v15 = vand.u32 2147483648, %v223_v33  ;;  %vm785_vm5 = vweird.f32 %v222_v20 }
  0xae   :  { %v1121_v6 = vpop.eup %1120  ;;  %v751_v18 = vmul.f32 %v1119_v60, %v220_v14  ;;  %vm756_vm0 = vweird.f32 %v1119_v60  ;;  %vm800_vm2 = vweird.f32 %v223_v33  ;;  %vm2113_vm3 = vcmp.eq.f32.partialorder %v789_v51, 8.507059e+37 }
  0xaf   :  { %899 = vst [vmem:[#allocation5 + $0x110] sm:$0xff] %v859_v21  ;;  %v766_v58 = vmul.f32 %v1121_v6, %v221_v52  ;;  %v1123_v35 = vpop.eup %1122  ;;  %vm771_vm1 = vweird.f32 %v1121_v6  ;;  %vm2109_vm4 = vmor %vm755_vm11, %vm756_vm0  ;;  %v792_v27 = vor.u32 1.1754944e-38, %v791_v4  ;;  %vm2122_vm8 = vcmp.eq.f32.partialorder %v804_v36, 8.507059e+37 }
  0xb0   :  { %v752_v40 = vsub.f32 1.0, %v751_v18  ;;  %v1125_v37 = vpop.eup %1124  ;;  %v781_v23 = vmul.f32 %v1123_v35, %v222_v20  ;;  %vm2118_vm6 = vmor %vm770_vm12, %vm771_vm1  ;;  %vm786_vm7 = vweird.f32 %v1123_v35  ;;  %v807_v29 = vor.u32 1.1754944e-38, %v806_v15 }
  0xb1   :  { %v767_v50 = vsub.f32 1.0, %v766_v58  ;;  %v796_v30 = vmul.f32 %v1125_v37, %v223_v33  ;;  %vm801_vm9 = vweird.f32 %v1125_v37  ;;  %vm815_vm10 = vweird.f32 %v2096_v57  ;;  %vm2135_vm14 = vmor %vm785_vm5, %vm786_vm7 }
  0xb2   :  { %v753_v11 = vmul.f32 %v1119_v60, %v752_v40  ;;  %v782_v3 = vsub.f32 1.0, %v781_v23  ;;  %v1127_v5 = vpop.eup %1126  ;;  %v819_v19 = vand.u32 2147483647, %v2096_v57  ;;  %vm802_vm11 = vmor %vm800_vm2, %vm801_vm9  ;;  %v821_v61 = vand.u32 2147483648, %v2096_v57 }
  0xb3   :  { %v768_v56 = vmul.f32 %v1121_v6, %v767_v50  ;;  %v797_v9 = vsub.f32 1.0, %v796_v30  ;;  %v811_v42 = vmul.f32 %v1127_v5, %v2096_v57 }
  0xb4   :  { %v754_v28 = vadd.f32 %v1119_v60, %v753_v11  ;;  %v783_v62 = vmul.f32 %v1123_v35, %v782_v3 }
  0xb5   :  { %v769_v31 = vadd.f32 %v1121_v6, %v768_v56  ;;  %v798_v16 = vmul.f32 %v1125_v37, %v797_v9  ;;  %v812_v45 = vsub.f32 1.0, %v811_v42 }
  0xb6   :  { %v758_v39 = vsel %vm2109_vm4, %v1119_v60, %v754_v28  ;;  %v784_v14 = vadd.f32 %v1123_v35, %v783_v62 }
  0xb7   :  { %v763_v34 = vsel %vm2099_vm13, %v762_v1, %v758_v39  ;;  %v773_v22 = vsel %vm2118_vm6, %v1121_v6, %v769_v31  ;;  %v799_v17 = vadd.f32 %v1125_v37, %v798_v16  ;;  %vm816_vm13 = vweird.f32 %v1127_v5 }
  0xb8   :  { %v860_v8 = vmul.f32 %v763_v34, %v1901_v26  ;;  %v778_v46 = vsel %vm2103_vm15, %v777_v10, %v773_v22  ;;  %v788_v32 = vsel %vm2135_vm14, %v1123_v35, %v784_v14  ;;  %v813_v47 = vmul.f32 %v1127_v5, %v812_v45  ;;  %vm817_vm12 = vmor %vm815_vm10, %vm816_vm13 }
  0xb9   :  { %v861_v52 = vmul.f32 %v778_v46, %v1916_v63  ;;  %v793_v26 = vsel %vm2113_vm3, %v792_v27, %v788_v32  ;;  %v803_v12 = vsel %vm802_vm11, %v1125_v37, %v799_v17  ;;  %v822_v63 = vor.u32 1.1754944e-38, %v821_v61 }
  0xba   :  { %900 = vst [vmem:[#allocation5 + $0x118] sm:$0xff] %v860_v8  ;;  %v862_v20 = vmul.f32 %v793_v26, %v1921_v7  ;;  %v808_v53 = vsel %vm2122_vm8, %v807_v29, %v803_v12  ;;  %v814_v33 = vadd.f32 %v1127_v5, %v813_v47  ;;  %vm820_vm15 = vcmp.eq.f32.partialorder %v819_v19, 8.507059e+37 }
  0xbb   :  { %901 = vst [vmem:[#allocation5 + $0x120] sm:$0x7] %v861_v52  ;;  %v863_v48 = vmul.f32 %v808_v53, %v1936_v41 }
  0xbc   :  { %902 = vst [vmem:[#allocation5 + $0x128] sm:$0x7] %v862_v20  ;;  %v818_v7 = vsel %vm817_vm12, %v1127_v5, %v814_v33 }
  0xbd   :  { %903 = vst [vmem:[#allocation5 + $0x130] sm:$0x7] %v863_v48  ;;  %v823_v43 = vsel %vm820_vm15, %v822_v63, %v818_v7 }
  0xbe   :  { %v864_v55 = vmul.f32 %v823_v43, %v2065_v13 }
  0xc0   :  { %904 = vst [vmem:[#allocation5 + $0x138] sm:$0x7] %v864_v55 }
  0xc1   :  { %917 = dma.vmem_to_hbm [thread:$0]  %s910_s13, 5120, %s912_s16, [#allocation4], %s1181_s11, %s1181_s11, %s1182_s12  }
  0xc2   :  { %1178 = dma.done.wait [#allocation4], 5120  }
  0xc3   :  { %1179 = vsyncadd [#allocation4], 4294962176 }
  0xc4   :  { %922 = vsyncpa [#allocation3], 1 }
  0xc5   :  { %923 = vsyncpa [#allocation4], 1 }

</bundles_post_ra>
